<compile_context>
chip_gen: v7x
topology: tpu7x:2x2x1
jax: 0.10.0
libtpu: 0.0.40
codegen_flags: <defaults>
</compile_context>

<pallas_src>
import functools

import jax
import jax.numpy as jnp
from jax import lax
from jax.experimental import pallas as pl
from jax.experimental.pallas import tpu as pltpu


# ------------------------------ Pallas kernel ------------------------------- #

def _fused_conv_bn_relu_pool_kernel(p_ref, w_ref, s_ref, b_ref, qmask_ref,
                                    o_ref, sbuf, *, R, PW):
    """Fused conv(7x7,s2) + BN + ReLU + maxpool(3x3,s2,p1) for one image.

    p_ref : (1, 4*R, K) bf16 im2col patches, rows ordered [ee, eo, oe, oo]
            (row/col parity classes), each R-row slab in pool (p, q) raster.
    w_ref : (K, C) bf16 conv weights.    s_ref/b_ref: (1, C) f32 folded BN.
    qmask_ref: (R, 1) f32, 1.0 where the destination pool column q >= 1.
    o_ref : (1, R, C) f32 pooled output (rows = pool (p, q) raster).
    sbuf  : (3, R + PW + 1, C) f32 VMEM scratch (zero halo implements shifts).
    """
    halo = PW + 1

    # Conv as a single MXU matmul, then folded BN + ReLU (all in f32).
    acc = jnp.dot(p_ref[0, :, :], w_ref[...],
                  preferred_element_type=jnp.float32)              # (4R, C)
    y = jnp.maximum(acc * s_ref[...] + b_ref[...], 0.0)

    ee = y[0 * R:1 * R, :]      # conv (2p,   2q  )
    eo = y[1 * R:2 * R, :]      # conv (2p,   2q+1)
    oe = y[2 * R:3 * R, :]      # conv (2p+1, 2q  )
    oo = y[3 * R:4 * R, :]      # conv (2p+1, 2q+1)

    # Contributions of the parity slabs to the 3x3/stride-2 pool windows.
    m00 = jnp.maximum(jnp.maximum(ee, eo), jnp.maximum(oe, oo))    # -> (p,   q)
    m01 = jnp.maximum(eo, oo)                                      # -> (p,   q+1)
    m10 = jnp.maximum(oe, oo)                                      # -> (p+1, q)
    m11 = oo                                                       # -> (p+1, q+1)

    c = m00.shape[1]
    # Zero halo rows + offset writes turn the flattened-row shifts into plain
    # contiguous reads (ReLU => 0 is the identity for the padded taps).
    sbuf[:, 0:halo, :] = jnp.zeros((3, halo, c), jnp.float32)
    sbuf[0, halo:, :] = m01
    sbuf[1, halo:, :] = m10
    sbuf[2, halo:, :] = m11

    mq = qmask_ref[...]                               # (R, 1) multiplicative mask
    c01 = sbuf[0, halo - 1:halo - 1 + R, :] * mq      # shift by 1       (q+1)
    c10 = sbuf[1, 1:1 + R, :]                         # shift by PW      (p+1)
    c11 = sbuf[2, 0:R, :] * mq                        # shift by PW + 1  (p+1,q+1)

    o_ref[0, :, :] = jnp.maximum(jnp.maximum(m00, c01), jnp.maximum(c10, c11))


# ------------------------------ Pallas wrapper ------------------------------ #

def fused_conv_bn_relu_pool(patches, w_mat, scale, bias, qmask, *, PH, PW):
    N, MP, K = patches.shape
    Cout = w_mat.shape[1]
    R = PH * PW
    assert MP == 4 * R

    kernel = functools.partial(_fused_conv_bn_relu_pool_kernel, R=R, PW=PW)
    return pl.pallas_call(
        kernel,
        out_shape=jax.ShapeDtypeStruct((N, R, Cout), jnp.float32),
        grid=(N,),
        in_specs=[
            pl.BlockSpec((1, MP, K), lambda n: (n, 0, 0)),
            pl.BlockSpec((K, Cout), lambda n: (0, 0)),      # VMEM-resident
            pl.BlockSpec((1, Cout), lambda n: (0, 0)),
            pl.BlockSpec((1, Cout), lambda n: (0, 0)),
            pl.BlockSpec((R, 1), lambda n: (0, 0)),
        ],
        out_specs=pl.BlockSpec((1, R, Cout), lambda n: (n, 0, 0)),
        scratch_shapes=[pltpu.VMEM((3, R + PW + 1, Cout), jnp.float32)],
        compiler_params=pltpu.CompilerParams(
            dimension_semantics=("parallel",),
            vmem_limit_bytes=32 * 1024 * 1024,
        ),
    )(patches, w_mat, scale, bias, qmask)


# -------------------------------- JAX glue ---------------------------------- #

def _im2col_parity_nhwc(x_nhwc, kh, kw, stride, pad):
    """im2col with rows ordered (row-parity, col-parity, p, q).  Returns
    (N, OH*OW, Cin*kh*kw) patches plus pool dims (PH, PW)."""
    N, H, W, Cin = x_nhwc.shape
    OH = (H + 2 * pad - kh) // stride + 1
    OW = (W + 2 * pad - kw) // stride + 1
    assert OH % 2 == 0 and OW % 2 == 0, "even conv output expected (e.g. 16/32/224 inputs)"
    PH, PW = OH // 2, OW // 2

    xp = jnp.pad(x_nhwc, ((0, 0), (pad, pad), (pad, pad), (0, 0)))
    taps = []
    for i in range(kh):
        for j in range(kw):
            taps.append(xp[:, i:i + stride * OH:stride, j:j + stride * OW:stride, :])
    K = Cin * kh * kw
    p = jnp.stack(taps, axis=-1)               # (N, OH, OW, Cin, kh*kw); k = cin*49 + tap
    p = p.reshape(N, OH, OW, K)
    p = p.reshape(N, PH, 2, PW, 2, K)          # oh = 2p'+sr, ow = 2q'+sc
    p = p.transpose(0, 2, 4, 1, 3, 5)          # (N, sr, sc, p', q', K)
    return p.reshape(N, OH * OW, K), PH, PW


def model_extractor_forward(x_nchw, params):
    """resnet18 prefix (conv1, bn1, relu, maxpool). x: (N, 3, H, W) float32."""
    conv_w = params["conv_w"]                  # (64, 3, 7, 7)
    scale = params["bn_scale"]                 # (64,) folded eval-mode BN
    bias = params["bn_bias"]
    cout = conv_w.shape[0]
    N = x_nchw.shape[0]

    x_nhwc = jnp.transpose(x_nchw, (0, 2, 3, 1))        # channel-last, once
    patches, PH, PW = _im2col_parity_nhwc(x_nhwc, kh=7, kw=7, stride=2, pad=3)
    # TODO(synk): for production image sizes, gather the 7x7 im2col in-kernel
    # (memory_space=pl.ANY + manual DMA) and add a grid axis over pool-row
    # blocks instead of materializing `patches` (~12x the input) in HBM.
    patches = patches.astype(jnp.bfloat16)
    w_mat = conv_w.reshape(cout, -1).T.astype(jnp.bfloat16)       # (Cin*49, 64)

    R = PH * PW
    qmask = (jnp.arange(R) % PW != 0).astype(jnp.float32).reshape(R, 1)

    pooled = fused_conv_bn_relu_pool(
        patches, w_mat,
        scale.reshape(1, cout).astype(jnp.float32),
        bias.reshape(1, cout).astype(jnp.float32),
        qmask, PH=PH, PW=PW)                             # (N, PH*PW, 64)

    return pooled.reshape(N, PH, PW, cout).transpose(0, 3, 1, 2)   # NCHW out


# ------------------------- params & pure-JAX reference ----------------------- #

def make_params():
    key = jax.random.PRNGKey(0)
    k1, k2, k3, k4, k5 = jax.random.split(key, 5)
    conv_w = 0.05 * jax.random.normal(k1, (64, 3, 7, 7), jnp.float32)
    gamma = 1.0 + 0.1 * jax.random.normal(k2, (64,), jnp.float32)
    beta = 0.1 * jax.random.normal(k3, (64,), jnp.float32)
    running_mean = 0.1 * jax.random.normal(k4, (64,), jnp.float32)
    running_var = 0.5 + jnp.abs(jax.random.normal(k5, (64,), jnp.float32))
    eps = 1e-5
    scale = gamma / jnp.sqrt(running_var + eps)          # folded eval-mode BN
    bias = beta - running_mean * scale
    return {"conv_w": conv_w, "bn_scale": scale, "bn_bias": bias}


def reference_forward(x_nchw, params):
    y = lax.conv_general_dilated(
        x_nchw, params["conv_w"], window_strides=(2, 2),
        padding=((3, 3), (3, 3)),
        dimension_numbers=("NCHW", "OIHW", "NCHW"),
        precision=lax.Precision.HIGHEST)
    y = y * params["bn_scale"].reshape(1, -1, 1, 1) + params["bn_bias"].reshape(1, -1, 1, 1)
    y = jnp.maximum(y, 0.0)
    return lax.reduce_window(y, -jnp.inf, lax.max,
                             window_dimensions=(1, 1, 3, 3),
                             window_strides=(1, 1, 2, 2),
                             padding=((0, 0), (0, 0), (1, 1), (1, 1)))


if __name__ == "__main__":
    params = make_params()
    x = jax.random.normal(jax.random.PRNGKey(0), (2, 3, 16, 16), jnp.float32)

    fwd = jax.jit(lambda xx: model_extractor_forward(xx, params))
    out = fwd(x)
    jax.block_until_ready(out)

    ref = reference_forward(x, params)
    assert out.shape == ref.shape == (2, 64, 4, 4), (out.shape, ref.shape)
    assert bool(jnp.all(jnp.isfinite(out)))
    assert bool(jnp.all(out >= 0.0))                     # ReLU precedes the pool
    # bf16 matmul inputs with f32 accumulation -> loose tolerance vs f32 ref.
    max_err = float(jnp.max(jnp.abs(out - ref)))
    assert bool(jnp.allclose(out, ref, rtol=5e-2, atol=1e-1)), max_err
    print("KERNEL_OK")
</pallas_src>

<mosaic_0001>
module attributes {stable_mosaic.version = 11 : i64} {
  func.func @_fused_conv_bn_relu_pool_kernel(%arg0: i32, %arg1: memref<1x64x147xbf16, #tpu.memory_space<vmem>>, %arg2: memref<147x64xbf16, #tpu.memory_space<vmem>>, %arg3: memref<1x64xf32, #tpu.memory_space<vmem>>, %arg4: memref<1x64xf32, #tpu.memory_space<vmem>>, %arg5: memref<16x1xf32, #tpu.memory_space<vmem>>, %arg6: memref<1x16x64xf32, #tpu.memory_space<vmem>>, %arg7: memref<3x21x64xf32, #tpu.memory_space<vmem>>) attributes {dimension_semantics = [#tpu.dimension_semantics<parallel>], iteration_bounds = array<i64: 2>, scalar_prefetch = 0 : i64, scratch_operands = 1 : i64, tpu.core_type = #tpu.core_type<tc>, window_params = [{transform_indices = @transform_0, window_bounds = array<i64: 1, 64, 147>}, {pipeline_mode = #tpu.pipeline_mode<synchronous>, transform_indices = @transform_1, window_bounds = array<i64: 147, 64>}, {pipeline_mode = #tpu.pipeline_mode<synchronous>, transform_indices = @transform_2, window_bounds = array<i64: 1, 64>}, {pipeline_mode = #tpu.pipeline_mode<synchronous>, transform_indices = @transform_3, window_bounds = array<i64: 1, 64>}, {pipeline_mode = #tpu.pipeline_mode<synchronous>, transform_indices = @transform_4, window_bounds = array<i64: 16, 1>}, {transform_indices = @transform_5, window_bounds = array<i64: 1, 16, 64>}]} {
    %c0 = arith.constant 0 : index
    %c0_0 = arith.constant 0 : index
    %c0_1 = arith.constant 0 : index
    %0 = vector.load %arg1[%c0, %c0_0, %c0_1] : memref<1x64x147xbf16, #tpu.memory_space<vmem>>, vector<1x64x147xbf16>
    %1 = vector.shape_cast %0 : vector<1x64x147xbf16> to vector<64x147xbf16>
    %c0_2 = arith.constant 0 : index
    %c0_3 = arith.constant 0 : index
    %2 = vector.load %arg2[%c0_2, %c0_3] : memref<147x64xbf16, #tpu.memory_space<vmem>>, vector<147x64xbf16>
    %cst = arith.constant dense<0.000000e+00> : vector<64x64xf32>
    %3 = tpu.matmul %1, %2, %cst {dimension_numbers = #tpu.dot_dimension_numbers<[1], [0], [0], [1], [0, 0, 1, 1], [], []>} : vector<64x147xbf16>, vector<147x64xbf16>, vector<64x64xf32> -> vector<64x64xf32>
    %c0_4 = arith.constant 0 : index
    %c0_5 = arith.constant 0 : index
    %4 = vector.load %arg3[%c0_4, %c0_5] : memref<1x64xf32, #tpu.memory_space<vmem>>, vector<1x64xf32>
    %5 = vector.broadcast %4 : vector<1x64xf32> to vector<64x64xf32>
    %6 = arith.mulf %3, %5 : vector<64x64xf32>
    %c0_6 = arith.constant 0 : index
    %c0_7 = arith.constant 0 : index
    %7 = vector.load %arg4[%c0_6, %c0_7] : memref<1x64xf32, #tpu.memory_space<vmem>>, vector<1x64xf32>
    %8 = vector.broadcast %7 : vector<1x64xf32> to vector<64x64xf32>
    %9 = arith.addf %6, %8 : vector<64x64xf32>
    %cst_8 = arith.constant 0.000000e+00 : f32
    %10 = vector.broadcast %cst_8 : f32 to vector<64x64xf32>
    %11 = arith.maximumf %9, %10 : vector<64x64xf32>
    %12 = vector.extract_strided_slice %11 {offsets = [0, 0], sizes = [16, 64], strides = [1, 1]} : vector<64x64xf32> to vector<16x64xf32>
    %13 = vector.extract_strided_slice %11 {offsets = [16, 0], sizes = [16, 64], strides = [1, 1]} : vector<64x64xf32> to vector<16x64xf32>
    %14 = vector.extract_strided_slice %11 {offsets = [32, 0], sizes = [16, 64], strides = [1, 1]} : vector<64x64xf32> to vector<16x64xf32>
    %15 = vector.extract_strided_slice %11 {offsets = [48, 0], sizes = [16, 64], strides = [1, 1]} : vector<64x64xf32> to vector<16x64xf32>
    %16 = arith.maximumf %12, %13 : vector<16x64xf32>
    %17 = arith.maximumf %14, %15 : vector<16x64xf32>
    %18 = arith.maximumf %16, %17 : vector<16x64xf32>
    %19 = arith.maximumf %13, %15 : vector<16x64xf32>
    %20 = arith.maximumf %14, %15 : vector<16x64xf32>
    %cst_9 = arith.constant 0.000000e+00 : f32
    %21 = vector.broadcast %cst_9 : f32 to vector<3x5x64xf32>
    %c0_10 = arith.constant 0 : index
    %c0_11 = arith.constant 0 : index
    %c0_12 = arith.constant 0 : index
    %22 = vector.load %arg7[%c0_10, %c0_11, %c0_12] : memref<3x21x64xf32, #tpu.memory_space<vmem>>, vector<3x5x64xf32>
    tpu.vector_store %arg7[%c0_10, %c0_11, %c0_12], %21 {strides = array<i32>} : memref<3x21x64xf32, #tpu.memory_space<vmem>>, vector<3x5x64xf32>,
    %c0_13 = arith.constant 0 : index
    %c5 = arith.constant 5 : index
    %c0_14 = arith.constant 0 : index
    %23 = vector.load %arg7[%c0_13, %c5, %c0_14] : memref<3x21x64xf32, #tpu.memory_space<vmem>>, vector<1x16x64xf32>
    %24 = vector.shape_cast %23 : vector<1x16x64xf32> to vector<16x64xf32>
    %25 = vector.shape_cast %19 : vector<16x64xf32> to vector<1x16x64xf32>
    tpu.vector_store %arg7[%c0_13, %c5, %c0_14], %25 {strides = array<i32>} : memref<3x21x64xf32, #tpu.memory_space<vmem>>, vector<1x16x64xf32>,
    %c1 = arith.constant 1 : index
    %c5_15 = arith.constant 5 : index
    %c0_16 = arith.constant 0 : index
    %26 = vector.load %arg7[%c1, %c5_15, %c0_16] : memref<3x21x64xf32, #tpu.memory_space<vmem>>, vector<1x16x64xf32>
    %27 = vector.shape_cast %26 : vector<1x16x64xf32> to vector<16x64xf32>
    %28 = vector.shape_cast %20 : vector<16x64xf32> to vector<1x16x64xf32>
    tpu.vector_store %arg7[%c1, %c5_15, %c0_16], %28 {strides = array<i32>} : memref<3x21x64xf32, #tpu.memory_space<vmem>>, vector<1x16x64xf32>,
    %c2 = arith.constant 2 : index
    %c5_17 = arith.constant 5 : index
    %c0_18 = arith.constant 0 : index
    %29 = vector.load %arg7[%c2, %c5_17, %c0_18] : memref<3x21x64xf32, #tpu.memory_space<vmem>>, vector<1x16x64xf32>
    %30 = vector.shape_cast %29 : vector<1x16x64xf32> to vector<16x64xf32>
    %31 = vector.shape_cast %15 : vector<16x64xf32> to vector<1x16x64xf32>
    tpu.vector_store %arg7[%c2, %c5_17, %c0_18], %31 {strides = array<i32>} : memref<3x21x64xf32, #tpu.memory_space<vmem>>, vector<1x16x64xf32>,
    %c0_19 = arith.constant 0 : index
    %c0_20 = arith.constant 0 : index
    %32 = vector.load %arg5[%c0_19, %c0_20] : memref<16x1xf32, #tpu.memory_space<vmem>>, vector<16x1xf32>
    %c0_21 = arith.constant 0 : index
    %c4 = arith.constant 4 : index
    %c0_22 = arith.constant 0 : index
    %33 = vector.load %arg7[%c0_21, %c4, %c0_22] : memref<3x21x64xf32, #tpu.memory_space<vmem>>, vector<1x16x64xf32>
    %34 = vector.shape_cast %33 : vector<1x16x64xf32> to vector<16x64xf32>
    %35 = vector.broadcast %32 : vector<16x1xf32> to vector<16x64xf32>
    %36 = arith.mulf %34, %35 : vector<16x64xf32>
    %c1_23 = arith.constant 1 : index
    %c1_24 = arith.constant 1 : index
    %c0_25 = arith.constant 0 : index
    %37 = vector.load %arg7[%c1_23, %c1_24, %c0_25] : memref<3x21x64xf32, #tpu.memory_space<vmem>>, vector<1x16x64xf32>
    %38 = vector.shape_cast %37 : vector<1x16x64xf32> to vector<16x64xf32>
    %c2_26 = arith.constant 2 : index
    %c0_27 = arith.constant 0 : index
    %c0_28 = arith.constant 0 : index
    %39 = vector.load %arg7[%c2_26, %c0_27, %c0_28] : memref<3x21x64xf32, #tpu.memory_space<vmem>>, vector<1x16x64xf32>
    %40 = vector.shape_cast %39 : vector<1x16x64xf32> to vector<16x64xf32>
    %41 = vector.broadcast %32 : vector<16x1xf32> to vector<16x64xf32>
    %42 = arith.mulf %40, %41 : vector<16x64xf32>
    %43 = arith.maximumf %18, %36 : vector<16x64xf32>
    %44 = arith.maximumf %38, %42 : vector<16x64xf32>
    %45 = arith.maximumf %43, %44 : vector<16x64xf32>
    %c0_29 = arith.constant 0 : index
    %c0_30 = arith.constant 0 : index
    %c0_31 = arith.constant 0 : index
    %46 = vector.load %arg6[%c0_29, %c0_30, %c0_31] : memref<1x16x64xf32, #tpu.memory_space<vmem>>, vector<1x16x64xf32>
    %47 = vector.shape_cast %46 : vector<1x16x64xf32> to vector<16x64xf32>
    %48 = vector.shape_cast %45 : vector<16x64xf32> to vector<1x16x64xf32>
    tpu.vector_store %arg6[%c0_29, %c0_30, %c0_31], %48 {strides = array<i32>} : memref<1x16x64xf32, #tpu.memory_space<vmem>>, vector<1x16x64xf32>,
    return
  }
  func.func @transform_0(%arg0: i32) -> (i32, i32, i32) {
    %c0_i32 = arith.constant 0 : i32
    %c0_i32_0 = arith.constant 0 : i32
    %c0_i32_1 = arith.constant 0 : i32
    return %arg0, %c0_i32, %c0_i32_0 : i32, i32, i32
  }
  func.func @transform_1(%arg0: i32) -> (i32, i32) {
    %c0_i32 = arith.constant 0 : i32
    %c0_i32_0 = arith.constant 0 : i32
    %c0_i32_1 = arith.constant 0 : i32
    return %c0_i32, %c0_i32_0 : i32, i32
  }
  func.func @transform_2(%arg0: i32) -> (i32, i32) {
    %c0_i32 = arith.constant 0 : i32
    %c0_i32_0 = arith.constant 0 : i32
    %c0_i32_1 = arith.constant 0 : i32
    return %c0_i32, %c0_i32_0 : i32, i32
  }
  func.func @transform_3(%arg0: i32) -> (i32, i32) {
    %c0_i32 = arith.constant 0 : i32
    %c0_i32_0 = arith.constant 0 : i32
    %c0_i32_1 = arith.constant 0 : i32
    return %c0_i32, %c0_i32_0 : i32, i32
  }
  func.func @transform_4(%arg0: i32) -> (i32, i32) {
    %c0_i32 = arith.constant 0 : i32
    %c0_i32_0 = arith.constant 0 : i32
    %c0_i32_1 = arith.constant 0 : i32
    return %c0_i32, %c0_i32_0 : i32, i32
  }
  func.func @transform_5(%arg0: i32) -> (i32, i32, i32) {
    %c0_i32 = arith.constant 0 : i32
    %c0_i32_0 = arith.constant 0 : i32
    %c0_i32_1 = arith.constant 0 : i32
    return %arg0, %c0_i32, %c0_i32_0 : i32, i32, i32
  }
}

</mosaic_0001>

<bundles_post_ra>
// kernel: _lambda_.1
= control target key start
LH: loop header
LB: loop body
LE: loop exit
PB: predicated region body
PF: predicated region fallthrough
CT: control target
= control target key end

     0   :  { %10 = vsyncpa [#allocation4], 0  ;;  %s1007_s0 = inlined_call_operand.vmem [shape: bf16[2,64,147], index: 0, kind: input, shape index: {}]   ;;  %s1008_s1 = inlined_call_operand.vmem [shape: bf16[147,64], index: 1, kind: input, shape index: {}]   ;;  %s1009_s2 = inlined_call_operand.vmem [shape: f32[1,64], index: 2, kind: input, shape index: {}]   ;;  %s1010_s3 = inlined_call_operand.vmem [shape: f32[1,64], index: 3, kind: input, shape index: {}]   ;;  %s1011_s4 = inlined_call_operand.vmem [shape: f32[16,1], index: 4, kind: input, shape index: {}]   ;;  %s1012_s5 = inlined_call_operand.hbm [shape: f32[2,16,64], index: 5, kind: output, shape index: {}]  }
   0x1   :  { %12 = vsyncpa [#allocation4 + $0x1], 0  ;;  %s819_s18 = smov 0   ;;  %s821_s19 = smov 0  }
   0x2   :  { %s823_s20 = smov 0   ;;  %s825_s21 = smov 0  }
   0x3 LB: > { %s840_s22 = sadd.s32 4294967295, %s781_s21   ;;  %s594_s23 = sadd.s32 4294967294, %s781_s21   ;;  %s781_s21 = sphi %s825_s21, %s1018_s21   ;;  %s777_s20 = sphi %s823_s20, %s1017_s20   ;;  %s773_s19 = sphi %s821_s19, %s1016_s19   ;;  %s769_s18 = sphi %s819_s18, %s1015_s18  }
   0x4   : > { %s844_s24 = sadd.s32 1, %s781_s21   ;;  %s135_s25 = sadd.s32 1, %s777_s20 }
   0x5   : > { %s132_s26 = ssub.s32 %s781_s21, %s844_s24  ;;  %p145_p0 = scmp.ne.s32.totalorder %s777_s20, %s773_s19 }
   0x6   : > { %p133_p1 = scmp.eq.s32.totalorder %s132_s26, 0  ;;  %p146_p2 = scmp.eq.s32.totalorder %s840_s22, 1 }
   0x7   : > { %p151_p3 = scmp.ne.s32.totalorder %s773_s19, %s769_s18  ;;  %p152_p4 = scmp.eq.s32.totalorder %s594_s23, 1 }
   0x8   : > { %s855_s27 = scalar_select %p133_p1, %s777_s20, %s135_s25  }
   0x9   : > { %p857_p5 = por %p146_p2, %p145_p0  ;;  %p861_p6 = por %p152_p4, %p151_p3 }
   0xa   : > { %p597_p7 = scmp.ge.s32.totalorder %s781_s21, 1  ;;  %p190_p8 = scmp.lt.s32.totalorder %s781_s21, 3 }
   0xc   : > { %p191_p9 = pnand %p597_p7, %p190_p8 }
   0xd   : > { %v697_v0 = vld [vmem:[%s1008_s1] sm:$0xff] (!%p191_p9)   ;;  %v783_v1 = vmov (!%p191_p9), 0   ;;  %v698_v2 = vld [vmem:[%s1008_s1 + $0x8] sm:$0xff] (!%p191_p9)   ;;  %v699_v3 = vld [vmem:[%s1008_s1 + $0x10] sm:$0xff] (!%p191_p9)   ;;  %p218_p10 = scmp.lt.s32.totalorder (!%p191_p9), %s840_s22, 1  ;;  %vm344_vm0 = vcmask (!%p191_p9), 154624  }
   0xe   : > { %194 = sbr.rel (%p191_p9) target bundleno = 314 (0x13a), region = 40  ;;  %364 = vmatprep.subr.bf16.mxu0 (!%p191_p9), %v783_v1  ;;  %632 = vmatprep.subr.bf16.mxu1 (!%p191_p9), %v783_v1  ;;  %v488_v4 = vld [vmem:[%s1011_s4] sm:$0xff] (!%p191_p9)  ;;  %v700_v5 = vld [vmem:[%s1008_s1 + $0x18] sm:$0xff] (!%p191_p9)   ;;  %v489_v9 = vld [vmem:[%s1011_s4 + $0x8] sm:$0xff] (!%p191_p9)  ;;  %vm357_vm1 = vcmask (!%p191_p9), 1040384   ;;  %vm358_vm2 = vcmask (!%p191_p9), 1041408  }
   0xf   : > { %365 = vmatpush1.bf16.msra.mxu0 (!%p191_p9), %v697_v0  ;;  %642 = vmatpush1.bf16.msra.mxu1 (!%p191_p9), %v697_v0  ;;  %v701_v6 = vld [vmem:[%s1008_s1 + $0x20] sm:$0xff] (!%p191_p9)   ;;  %v702_v10 = vld [vmem:[%s1008_s1 + $0x28] sm:$0xff] (!%p191_p9)   ;;  %v703_v11 = vld [vmem:[%s1008_s1 + $0x30] sm:$0xff] (!%p191_p9)   ;;  %v784_v13 = vmov (!%p191_p9), 65535   ;;  %vm475_vm3 = vcmask (!%p191_p9), 520192   ;;  %v785_v25 = vmov (!%p191_p9), 0.0  }
  0x10   : > { %366 = vmatprep.subr.bf16.mxu0 (!%p191_p9), %v783_v1  ;;  %633 = vmatprep.subr.bf16.mxu1 (!%p191_p9), %v783_v1  ;;  %v704_v12 = vld [vmem:[%s1008_s1 + $0x38] sm:$0xff] (!%p191_p9)   ;;  %v359_v14 = vsel (!%p191_p9), %vm357_vm1, 4294967295, %v784_v13  ;;  %v705_v15 = vld [vmem:[%s1008_s1 + $0x40] sm:$0xff] (!%p191_p9)   ;;  %v706_v16 = vld [vmem:[%s1008_s1 + $0x48] ss:$0 sps:$4 sm:$0x33] (!%p191_p9)  }
  0x11   : > { %696 = vset.pattern.permute.xlu0 (!%p191_p9), %v783_v1  ;;  %v360_v17 = vsel (!%p191_p9), %vm358_vm2, %v359_v14, 0  ;;  %476 = vst.msk [vmem:[#allocation2] sm:$0x1f] (!%p191_p9), %vm475_vm3, %v785_v25  ;;  %477 = vst.msk [vmem:[#allocation2 + $0x18] sm:$0x1f] (!%p191_p9), %vm475_vm3, %v785_v25  ;;  %vm479_vm4 = vcmask (!%p191_p9), 523264  }
  0x12   : > { %494 = vperm.xlu0 (!%p191_p9), %696, %v488_v4   ;;  %v362_v18 = vand.u32 (!%p191_p9), %v706_v16, %v360_v17  ;;  %478 = vst.msk [vmem:[#allocation2 + $0x30] sm:$0x1f] (!%p191_p9), %vm475_vm3, %v785_v25  ;;  %v623_v28 = vld [vmem:[%s1009_s2] ss:$0 sm:$0xff] (!%p191_p9)  ;;  %s215_s6 = sand.u32 (!%p191_p9), 1, %s773_s19   ;;  %s631_s8 = sshll.u32 (!%p191_p9), %s840_s22, 8 }
  0x13   : > { %367 = vmatpush1.bf16.msra.mxu0 (!%p191_p9), %v698_v2  ;;  %643 = vmatpush1.bf16.msra.mxu1 (!%p191_p9), %v698_v2  ;;  %v624_v37 = vld [vmem:[%s1010_s3] ss:$0 sm:$0xff] (!%p191_p9)  ;;  %s598_s7 = sshll.u32 (!%p191_p9), %s215_s6, 4  ;;  %s961_s13 = scalar_lea.hbm (!%p191_p9), %s1012_s5, %s631_s8 }
  0x14   : > { %368 = vmatprep.subr.bf16.mxu0 (!%p191_p9), %v783_v1  ;;  %634 = vmatprep.subr.bf16.mxu1 (!%p191_p9), %v783_v1  ;;  %s217_s9 = scalar_lea.vmem (!%p191_p9), [#allocation3], %s598_s7  ;;  %s786_s15 = smov (!%p191_p9), [#allocation3]  }
  0x15   : > { %s219_s11 = scalar_select %p218_p10, %s840_s22, 1 }
  0x16   : > { %499 = vperm.xlu0 %696, %v489_v9   ;;  %s532_s10 = sshll.u32 %s217_s9, 4  ;;  %s966_s22 = scalar_lea.sflag [#allocation4], %s215_s6  ;;  %s963_s10 = int_to_ptr.vmem [resolvable:$true] %s532_s10 }
  0x17   : > { %369 = vmatpush1.bf16.msra.mxu0 %v699_v3  ;;  %644 = vmatpush1.bf16.msra.mxu1 %v699_v3  ;;  %s630_s16 = sshll.u32 %s219_s11, 6  ;;  %s719_s14 = scalar_lea.vmem %s963_s10, 256 }
  0x18   : > { %370 = vmatprep.subr.bf16.mxu0 %v783_v1  ;;  %635 = vmatprep.subr.bf16.mxu1 %v783_v1  ;;  %s896_s25 = scalar_lea.vmem %s1007_s0, %s630_s16  ;;  %p720_p11 = scmp.ne.s32.totalorder %s963_s10, %s719_s14 }
  0x19   : > { %v709_v7 = vld [vmem:[%s896_s25 + $0x4] ss:$8 sps:$4 sm:$0xff]   ;;  %v707_v19 = vld [vmem:[%s896_s25] ss:$8 sps:$4 sm:$0xff]   ;;  %v713_v21 = vld [vmem:[%s896_s25 + $0x14] ss:$8 sps:$4 sm:$0xff]  }
  0x1a   : > { %v712_v8 = vld [vmem:[%s896_s25 + $0x24] ss:$8 sps:$4 sm:$0xff]   ;;  %619 = vmatprep.mubr.msk.bf16.mxu0 %vm344_vm0, %v709_v7  ;;  %v710_v20 = vld [vmem:[%s896_s25 + $0x20] ss:$8 sps:$4 sm:$0xff]   ;;  %v715_v22 = vld [vmem:[%s896_s25 + $0x34] ss:$8 sps:$4 sm:$0xff]   ;;  %p721_p12 = pnand %p720_p11, %p857_p5 }
  0x1b   : > { %371 = vmatpush1.bf16.msra.mxu0 %v700_v5  ;;  %645 = vmatpush1.bf16.msra.mxu1 %v700_v5  ;;  %v717_v23 = vld [vmem:[%s896_s25 + $0x10] ss:$8 sps:$4 sm:$0xff]   ;;  %s723_s16 = sshll.u32 %s786_s15, 4  ;;  %s724_s16 = int_to_ptr.vmem [resolvable:$false] %s723_s16 }
  0x1c   : > { %372 = vmatprep.subr.bf16.mxu0 %v783_v1  ;;  %636 = vmatprep.subr.bf16.mxu1 %v783_v1  ;;  %v718_v24 = vld [vmem:[%s896_s25 + $0x30] ss:$8 sps:$4 sm:$0xff]   ;;  %p722_p13 = pneg %p721_p12  ;;  %s725_s17 = scalar_lea.vmem %s724_s16, 512 }
  0x1d   : > { %621 = vmatprep.mubr.msk.bf16.mxu1 %vm344_vm0, %v712_v8  ;;  %p726_p0 = scmp.lt.s32.totalorder %s963_s10, %s724_s16  ;;  %p727_p1 = scmp.lt.s32.totalorder %s725_s17, %s719_s14 }
  0x1f   : > { %373 = vmatpush1.bf16.msra.mxu0 %v701_v6  ;;  %646 = vmatpush1.bf16.msra.mxu1 %v701_v6  ;;  %p728_p2 = por %p727_p1, %p726_p0 }
  0x20   : > { %374 = vmatprep.subr.bf16.mxu0 %v783_v1  ;;  %637 = vmatprep.subr.bf16.mxu1 %v783_v1 }
  0x21   : > { %p729_p3 = pnand %p728_p2, %p722_p13 }
  0x23   : > { %375 = vmatpush1.bf16.msra.mxu0 %v702_v10  ;;  %647 = vmatpush1.bf16.msra.mxu1 %v702_v10 }
  0x24   : > { %376 = vmatprep.subr.bf16.mxu0 %v783_v1  ;;  %638 = vmatprep.subr.bf16.mxu1 %v783_v1 }
  0x27   : > { %377 = vmatpush1.bf16.msra.mxu0 %v703_v11  ;;  %648 = vmatpush1.bf16.msra.mxu1 %v703_v11 }
  0x28   : > { %378 = vmatprep.subr.bf16.mxu0 %v783_v1  ;;  %639 = vmatprep.subr.bf16.mxu1 %v783_v1 }
  0x2b   : > { %379 = vmatpush1.bf16.msra.mxu0 %v704_v12  ;;  %649 = vmatpush1.bf16.msra.mxu1 %v704_v12 }
  0x2c   : > { %380 = vmatprep.subr.bf16.mxu0 %v783_v1  ;;  %640 = vmatprep.subr.bf16.mxu1 %v783_v1 }
  0x2f   : > { %381 = vmatpush1.bf16.msra.mxu0 %v705_v15  ;;  %650 = vmatpush1.bf16.msra.mxu1 %v705_v15 }
  0x30   : > { %382 = vmatprep.subr.bf16.mxu0 %v783_v1  ;;  %641 = vmatprep.subr.bf16.mxu1 %v783_v1 }
  0x33   : > { %383 = vmatpush1.bf16.msra.mxu0 %v362_v18  ;;  %651 = vmatpush1.bf16.msra.mxu1 %v362_v18 }
  0x36   : > { %397 = vmatmul.mubr.bf16.vlgmr.msra.gmra.mrb[0].mxu0 %v707_v19  ;;  %413 = vmatmul.mubr.bf16.vlgmr.msra.gmra.mrb[0].mxu1 %v710_v20 }
  0x37   : > { %620 = vmatprep.mubr.msk.bf16.mxu0 %vm344_vm0, %v713_v21  ;;  %622 = vmatprep.mubr.msk.bf16.mxu1 %vm344_vm0, %v715_v22 }
  0x3e   : > { %405 = vmatmul.mubr.bf16.gmra.mrb[4].mxu0 %v717_v23  ;;  %421 = vmatmul.mubr.bf16.gmra.mrb[4].mxu1 %v718_v24 }
  0x91   : > { %v495_v11 = vpop.permute.xlu0 %494 }
  0x95   : > { %v500_v18 = vpop.permute.xlu0 %499 }
 0x109   : > { %v398_v26 = vpop.f32.mrb[0].mxu0  ;;  %v414_v27 = vpop.f32.mrb[0].mxu1 }
 0x10a   : > { %v400_v29 = vpop.f32.mrb[1].mxu0  ;;  %v416_v30 = vpop.f32.mrb[1].mxu1  ;;  %v436_v35 = vmul.f32 %v623_v28, %v398_v26  ;;  %v440_v36 = vmul.f32 %v623_v28, %v414_v27 }
 0x10b   : > { %v401_v31 = vpop.f32.mrb[2].mxu0  ;;  %v417_v32 = vpop.f32.mrb[2].mxu1 }
 0x10c   : > { %v403_v33 = vpop.f32.mrb[3].mxu0  ;;  %v419_v34 = vpop.f32.mrb[3].mxu1  ;;  %v437_v38 = vmul.f32 %v623_v28, %v401_v31  ;;  %v451_v39 = vadd.f32 %v624_v37, %v436_v35  ;;  %v455_v40 = vadd.f32 %v624_v37, %v440_v36  ;;  %v441_v41 = vmul.f32 %v623_v28, %v417_v32 }
 0x10e   : > { %v452_v48 = vadd.f32 %v624_v37, %v437_v38  ;;  %v459_v57 = vmax.f32 %v451_v39, 0.0  ;;  %v463_v58 = vmax.f32 %v455_v40, 0.0  ;;  %v456_v59 = vadd.f32 %v624_v37, %v441_v41 }
 0x110   : > { %v460_v0 = vmax.f32 %v452_v48, 0.0  ;;  %v464_v5 = vmax.f32 %v456_v59, 0.0 }
 0x111   : > { %v406_v42 = vpop.f32.mrb[4].mxu0  ;;  %v422_v43 = vpop.f32.mrb[4].mxu1 }
 0x112   : > { %v438_v44 = vmul.f32 %v623_v28, %v406_v42  ;;  %v442_v45 = vmul.f32 %v623_v28, %v422_v43  ;;  %v408_v46 = vpop.f32.mrb[5].mxu0  ;;  %v424_v47 = vpop.f32.mrb[5].mxu1 }
 0x113   : > { %v409_v49 = vpop.f32.mrb[6].mxu0  ;;  %v425_v50 = vpop.f32.mrb[6].mxu1 }
 0x114   : > { %v453_v51 = vadd.f32 %v624_v37, %v438_v44  ;;  %v457_v52 = vadd.f32 %v624_v37, %v442_v45  ;;  %v439_v53 = vmul.f32 %v623_v28, %v409_v49  ;;  %v443_v54 = vmul.f32 %v623_v28, %v425_v50  ;;  %v411_v55 = vpop.f32.mrb[7].mxu0  ;;  %v427_v56 = vpop.f32.mrb[7].mxu1 }
 0x116   : > { %v461_v60 = vmax.f32 %v453_v51, 0.0  ;;  %v465_v61 = vmax.f32 %v457_v52, 0.0  ;;  %v454_v62 = vadd.f32 %v624_v37, %v439_v53  ;;  %v458_v63 = vadd.f32 %v624_v37, %v443_v54 }
 0x118   : > { %v467_v1 = vmax.f32 %v459_v57, %v461_v60  ;;  %v469_v2 = vmax.f32 %v463_v58, %v465_v61  ;;  %v473_v3 = vmax.f32 %v461_v60, %v465_v61  ;;  %486 = vst.msk [vmem:[#allocation2 + $0x35] sm:$0xff] %vm479_vm4, %v465_v61  ;;  %v462_v4 = vmax.f32 %v454_v62, 0.0 }
 0x119   : > { %v466_v6 = vmax.f32 %v458_v63, 0.0 }
 0x11a   : > { %480 = vst.msk [vmem:[#allocation2 + $0x5] sm:$0xff] %vm479_vm4, %v473_v3  ;;  %483 = vst.msk [vmem:[#allocation2 + $0x1d] sm:$0xff] %vm479_vm4, %v469_v2  ;;  %v468_v7 = vmax.f32 %v460_v0, %v462_v4  ;;  %v471_v8 = vmax.f32 %v467_v1, %v469_v2 }
 0x11b   : > { %v474_v9 = vmax.f32 %v462_v4, %v466_v6  ;;  %487 = vst.msk [vmem:[#allocation2 + $0x3d] sm:$0xff] %vm479_vm4, %v466_v6  ;;  %v470_v10 = vmax.f32 %v464_v5, %v466_v6 }
 0x11d   : > { %481 = vst.msk [vmem:[#allocation2 + $0xd] sm:$0xff] %vm479_vm4, %v474_v9  ;;  %v472_v12 = vmax.f32 %v468_v7, %v470_v10  ;;  %484 = vst.msk [vmem:[#allocation2 + $0x25] sm:$0xff] %vm479_vm4, %v470_v10 }
 0x11f   : > { %v506_v13 = vld [vmem:[#allocation2 + $0x30] sm:$0xff] }
 0x120   : > { %v508_v14 = vmul.f32 %v506_v13, %v495_v11 }
 0x121   : > { %v490_v15 = vld [vmem:[#allocation2 + $0x4] sm:$0xff]  ;;  %v504_v16 = vld [vmem:[#allocation2 + $0x19] sm:$0xff] }
 0x122   : > { %v502_v17 = vmul.f32 %v495_v11, %v490_v15  ;;  %v507_v19 = vld [vmem:[#allocation2 + $0x38] sm:$0xff]  ;;  %v512_v22 = vmax.f32 %v504_v16, %v508_v14 }
 0x123   : > { %v509_v20 = vmul.f32 %v507_v19, %v500_v18 }
 0x124   : > { %v510_v21 = vmax.f32 %v471_v8, %v502_v17  ;;  %v491_v23 = vld [vmem:[#allocation2 + $0xc] sm:$0xff]  ;;  %v505_v24 = vld [vmem:[#allocation2 + $0x21] sm:$0xff] }
 0x125   : > { %v503_v25 = vmul.f32 %v500_v18, %v491_v23  ;;  %v513_v28 = vmax.f32 %v505_v24, %v509_v20 }
 0x126   : > { %v514_v26 = vmax.f32 %v510_v21, %v512_v22 }
 0x127   : > { %v511_v27 = vmax.f32 %v472_v12, %v503_v25 }
 0x128   : > { %516 = vst.msk [vmem:[%s217_s9] sm:$0xff] %vm479_vm4, %v514_v26 }
 0x129   : > { %v515_v29 = vmax.f32 %v511_v27, %v513_v28 }
 0x12b   : > { %517 = vst.msk [vmem:[%s217_s9 + $0x8] sm:$0xff] %vm479_vm4, %v515_v29 }
 0x12c   : > { %732 = shalt.err (!%p729_p3)
}
 0x12d   : > { %s733_s23 = scalar_lea.hbm %s961_s13, 256  ;;  %s737_s30 = scalar_lea.hbm %s1012_s5, 512 }
 0x12e   : > { %p734_p4 = scmp.ne.s32.totalorder %s961_s13, %s733_s23  ;;  %p738_p9 = scmp.lt.u32.totalorder %s961_s13, %s1012_s5 }
 0x12f   : > { %p739_p10 = scmp.lt.u32.totalorder %s737_s30, %s733_s23  ;;  %p741_p12 = scmp.lt.u32.totalorder %s733_s23, %s961_s13 }
 0x130   : > { %p735_p7 = pnand %p734_p4, %p857_p5 }
 0x131   : > { %p740_p11 = por %p739_p10, %p738_p9 }
 0x132   : > { %p736_p8 = pneg %p735_p7 }
 0x133   : > { %p742_p13 = por %p741_p12, %p740_p11 }
 0x135   : > { %p743_p0 = pnand %p742_p13, %p736_p8 }
 0x137   : > { %746 = shalt.err (!%p743_p0)
}
 0x138   : > { %s787_s8 = smov 128   ;;  %s788_s9 = smov 8  }
 0x139   : > { %652 = dma.vmem_to_hbm [thread:$0]  (%p857_p5), %s963_s10, 256, %s961_s13, %s966_s22, %s787_s8, %s787_s8, %s788_s9  }
 0x13a PF: > { %p658_p1 = scmp.ge.s32.totalorder %s781_s21, 2  ;;  %s547_s11 = sand.u32 1, %s769_s18  }
 0x13b   : > { %s548_s12 = scalar_lea.sflag [#allocation4], %s547_s11 }
 0x13c   : > { %p655_p2 = pnand %p658_p1, %p861_p6 }
 0x13e   : > { %764 = dma.done.wait (!%p655_p2), %s548_s12, 256  }
 0x13f   : > { %766 = vsyncadd (!%p655_p2), %s548_s12, 4294967040  ;;  %p15_p3 = scmp.ge.s32.totalorder %s844_s24, 4   ;;  %s1015_s18 = smov %s773_s19 }
 0x140   : > { %s1016_s19 = smov %s777_s20  ;;  %s1017_s20 = smov %s855_s27 }
 0x141   : > { %s1018_s21 = smov %s844_s24  ;;  %17 = sbr.rel (!%p15_p3) target bundleno = 3 (0x3), region = 77 }
 0x148   :  { %553 = vsyncpa [#allocation4], 1 }
 0x149   :  { %555 = vsyncpa [#allocation4 + $0x1], 1 }

</bundles_post_ra>
